<compile_context>
chip_gen: v5e
topology: v5e:2x2
jax: 0.10.0
libtpu: 0.0.40
codegen_flags: <defaults>
</compile_context>

<pallas_src>
import jax
import jax.numpy as jnp
from jax.experimental import pallas as pl
from jax.experimental.pallas import tpu as pltpu


IN_FEATURES = 28 * 28   # 784
HIDDEN = 128
OUT_FEATURES = 10

VMEM_LIMIT_BYTES = 32 << 20   # safe on v5e/v6e (128 MiB phys) and v7x (64 MiB phys)


def qynn_kernel(x_ref, w1_ref, b1_ref, w2_ref, b2_ref, o_ref):
    # x_ref:  (TM, 784)  f32     w1_ref: (784, 128) bf16   b1_ref: (1, 128) f32
    # w2_ref: (128, 10)  bf16    b2_ref: (1, 10)    f32    o_ref:  (TM, 10) f32
    x = x_ref[...].astype(jnp.bfloat16)          # cast fused in-kernel (VPU, hidden under DMA)
    # fc1: bf16 MXU matmul with f32 accumulation; bias + ReLU in f32.
    h = jnp.dot(x, w1_ref[...], preferred_element_type=jnp.float32) + b1_ref[...]
    h = jnp.maximum(h, 0.0)
    # fc2: hidden cast to bf16 for the MXU, accumulate in f32, bias in f32.
    y = jnp.dot(h.astype(jnp.bfloat16), w2_ref[...],
                preferred_element_type=jnp.float32) + b2_ref[...]
    o_ref[...] = y


def _round_up(x, m):
    return ((x + m - 1) // m) * m


def _pick_tm(B, tm_max):
    """Batch tile: multiple of 8, capped at the batch, >=2 grid steps when possible."""
    tm = min(tm_max, _round_up(B, 8))
    if B >= 32:
        # Ensure at least 2 grid steps so the "parallel" axis shards across both
        # v7x TensorCores and the software pipeline actually overlaps.
        tm = min(tm, _round_up(pl.cdiv(B, 2), 16))
    return max(8, tm)


def prepare_params(w1, b1, w2, b2):
    """One-time weight prep (hoisted out of the per-call forward).

    Weights are (in_features, out_features) so the kernel computes x @ W.
    Weights in bf16 (MXU fast path); biases stay f32 (added to f32 accumulator).
    """
    return (w1.astype(jnp.bfloat16),
            b1.reshape(1, HIDDEN).astype(jnp.float32),
            w2.astype(jnp.bfloat16),
            b2.reshape(1, OUT_FEATURES).astype(jnp.float32))


def qynn_forward(x_nchw, params, *, tm=2048):
    """x_nchw: (B, 1, 28, 28) float32. Returns (B, 10) float32 logits."""
    w1_b, b1_2d, w2_b, b2_2d = params
    B = x_nchw.shape[0]
    x = x_nchw.reshape(B, IN_FEATURES)           # torch.flatten(x, 1); kept f32

    tm = _pick_tm(B, tm)
    grid = (pl.cdiv(B, tm),)                     # ragged last block handled by Pallas

    flops = 2 * B * IN_FEATURES * HIDDEN + 2 * B * HIDDEN * OUT_FEATURES
    bytes_accessed = (B * IN_FEATURES * 4                 # x (f32)
                      + IN_FEATURES * HIDDEN * 2          # w1 (bf16)
                      + HIDDEN * OUT_FEATURES * 2         # w2 (bf16)
                      + (HIDDEN + OUT_FEATURES) * 4       # biases (f32)
                      + B * OUT_FEATURES * 4)             # output (f32)

    out = pl.pallas_call(
        qynn_kernel,
        out_shape=jax.ShapeDtypeStruct((B, OUT_FEATURES), jnp.float32),
        grid_spec=pltpu.PrefetchScalarGridSpec(
            num_scalar_prefetch=0,
            grid=grid,
            in_specs=[
                pl.BlockSpec((tm, IN_FEATURES), lambda i: (i, 0)),        # x tile (f32)
                pl.BlockSpec((IN_FEATURES, HIDDEN), lambda i: (0, 0)),    # w1 (VMEM-resident)
                pl.BlockSpec((1, HIDDEN), lambda i: (0, 0)),              # b1 (resident)
                pl.BlockSpec((HIDDEN, OUT_FEATURES), lambda i: (0, 0)),   # w2 (resident)
                pl.BlockSpec((1, OUT_FEATURES), lambda i: (0, 0)),        # b2 (resident)
            ],
            out_specs=pl.BlockSpec((tm, OUT_FEATURES), lambda i: (i, 0)),
        ),
        compiler_params=pltpu.CompilerParams(
            dimension_semantics=("parallel",),
            vmem_limit_bytes=VMEM_LIMIT_BYTES),
        cost_estimate=pl.CostEstimate(
            flops=flops, transcendentals=0, bytes_accessed=bytes_accessed),
    )(x, w1_b, b1_2d, w2_b, b2_2d)

    return out


def init_params(key):
    """Deterministic init mirroring nn.Linear's U(-1/sqrt(fan_in), 1/sqrt(fan_in)).

    Weights stored as (in_features, out_features) (transposed vs PyTorch) so
    the kernel computes x @ W directly.
    """
    k1, k2, k3, k4 = jax.random.split(key, 4)
    bound1 = 1.0 / (IN_FEATURES ** 0.5)
    bound2 = 1.0 / (HIDDEN ** 0.5)
    w1 = jax.random.uniform(k1, (IN_FEATURES, HIDDEN), jnp.float32, -bound1, bound1)
    b1 = jax.random.uniform(k2, (HIDDEN,), jnp.float32, -bound1, bound1)
    w2 = jax.random.uniform(k3, (HIDDEN, OUT_FEATURES), jnp.float32, -bound2, bound2)
    b2 = jax.random.uniform(k4, (OUT_FEATURES,), jnp.float32, -bound2, bound2)
    return w1, b1, w2, b2


if __name__ == "__main__":
    key = jax.random.PRNGKey(0)
    k_x, k_p = jax.random.split(key)

    B = 8
    x = jax.random.normal(k_x, (B, 1, 28, 28), jnp.float32)  # NCHW, like MNIST
    w1, b1, w2, b2 = init_params(k_p)
    params = prepare_params(w1, b1, w2, b2)

    out = qynn_forward(x, params)
    out = jax.block_until_ready(out)
    assert out.shape == (B, OUT_FEATURES)

    # Reference 1: matches the kernel math (bf16 inputs/weights, f32 accumulation).
    x_flat = x.reshape(B, -1)
    xb = x_flat.astype(jnp.bfloat16).astype(jnp.float32)
    w1b = w1.astype(jnp.bfloat16).astype(jnp.float32)
    w2b = w2.astype(jnp.bfloat16).astype(jnp.float32)
    h = jnp.maximum(xb @ w1b + b1, 0.0)
    ref_bf16 = h.astype(jnp.bfloat16).astype(jnp.float32) @ w2b + b2
    assert jnp.allclose(out, ref_bf16, atol=2e-3, rtol=2e-3)

    # Reference 2: full-f32 PyTorch-equivalent forward (loose check, bf16 matmul path).
    ref_f32 = jnp.maximum(x_flat @ w1 + b1, 0.0) @ w2 + b2
    assert jnp.allclose(out, ref_f32, atol=5e-2, rtol=5e-2)

    print("KERNEL_OK")
</pallas_src>

<mosaic_0001>
module attributes {stable_mosaic.version = 11 : i64} {
  func.func @qynn_kernel(%arg0: i32, %arg1: memref<8x784xf32, #tpu.memory_space<vmem>>, %arg2: memref<784x128xbf16, #tpu.memory_space<vmem>>, %arg3: memref<1x128xf32, #tpu.memory_space<vmem>>, %arg4: memref<128x10xbf16, #tpu.memory_space<vmem>>, %arg5: memref<1x10xf32, #tpu.memory_space<vmem>>, %arg6: memref<8x10xf32, #tpu.memory_space<vmem>>) attributes {dimension_semantics = [#tpu.dimension_semantics<parallel>], iteration_bounds = array<i64: 1>, scalar_prefetch = 0 : i64, scratch_operands = 0 : i64, tpu.core_type = #tpu.core_type<tc>, window_params = [{transform_indices = @transform_0, window_bounds = array<i64: 8, 784>}, {pipeline_mode = #tpu.pipeline_mode<synchronous>, transform_indices = @transform_1, window_bounds = array<i64: 784, 128>}, {pipeline_mode = #tpu.pipeline_mode<synchronous>, transform_indices = @transform_2, window_bounds = array<i64: 1, 128>}, {pipeline_mode = #tpu.pipeline_mode<synchronous>, transform_indices = @transform_3, window_bounds = array<i64: 128, 10>}, {pipeline_mode = #tpu.pipeline_mode<synchronous>, transform_indices = @transform_4, window_bounds = array<i64: 1, 10>}, {transform_indices = @transform_5, window_bounds = array<i64: 8, 10>}]} {
    %c0 = arith.constant 0 : index
    %c0_0 = arith.constant 0 : index
    %0 = vector.load %arg1[%c0, %c0_0] : memref<8x784xf32, #tpu.memory_space<vmem>>, vector<8x784xf32>
    %1 = arith.truncf %0 : vector<8x784xf32> to vector<8x784xbf16>
    %c0_1 = arith.constant 0 : index
    %c0_2 = arith.constant 0 : index
    %2 = vector.load %arg2[%c0_1, %c0_2] : memref<784x128xbf16, #tpu.memory_space<vmem>>, vector<784x128xbf16>
    %cst = arith.constant dense<0.000000e+00> : vector<8x128xf32>
    %3 = tpu.matmul %1, %2, %cst {dimension_numbers = #tpu.dot_dimension_numbers<[1], [0], [0], [1], [0, 0, 1, 1], [], []>} : vector<8x784xbf16>, vector<784x128xbf16>, vector<8x128xf32> -> vector<8x128xf32>
    %c0_3 = arith.constant 0 : index
    %c0_4 = arith.constant 0 : index
    %4 = vector.load %arg3[%c0_3, %c0_4] : memref<1x128xf32, #tpu.memory_space<vmem>>, vector<1x128xf32>
    %5 = vector.broadcast %4 : vector<1x128xf32> to vector<8x128xf32>
    %6 = arith.addf %3, %5 : vector<8x128xf32>
    %cst_5 = arith.constant 0.000000e+00 : f32
    %7 = vector.broadcast %cst_5 : f32 to vector<8x128xf32>
    %8 = arith.maximumf %6, %7 : vector<8x128xf32>
    %9 = arith.truncf %8 : vector<8x128xf32> to vector<8x128xbf16>
    %c0_6 = arith.constant 0 : index
    %c0_7 = arith.constant 0 : index
    %10 = vector.load %arg4[%c0_6, %c0_7] : memref<128x10xbf16, #tpu.memory_space<vmem>>, vector<128x10xbf16>
    %cst_8 = arith.constant dense<0.000000e+00> : vector<8x10xf32>
    %11 = tpu.matmul %9, %10, %cst_8 {dimension_numbers = #tpu.dot_dimension_numbers<[1], [0], [0], [1], [0, 0, 1, 1], [], []>} : vector<8x128xbf16>, vector<128x10xbf16>, vector<8x10xf32> -> vector<8x10xf32>
    %c0_9 = arith.constant 0 : index
    %c0_10 = arith.constant 0 : index
    %12 = vector.load %arg5[%c0_9, %c0_10] : memref<1x10xf32, #tpu.memory_space<vmem>>, vector<1x10xf32>
    %13 = vector.broadcast %12 : vector<1x10xf32> to vector<8x10xf32>
    %14 = arith.addf %11, %13 : vector<8x10xf32>
    %c0_11 = arith.constant 0 : index
    %c0_12 = arith.constant 0 : index
    %15 = vector.load %arg6[%c0_11, %c0_12] : memref<8x10xf32, #tpu.memory_space<vmem>>, vector<8x10xf32>
    tpu.vector_store %arg6[%c0_11, %c0_12], %14 {strides = array<i32>} : memref<8x10xf32, #tpu.memory_space<vmem>>, vector<8x10xf32>,
    return
  }
  func.func @transform_0(%arg0: i32) -> (i32, i32) {
    %c0_i32 = arith.constant 0 : i32
    %c0_i32_0 = arith.constant 0 : i32
    return %arg0, %c0_i32 : i32, i32
  }
  func.func @transform_1(%arg0: i32) -> (i32, i32) {
    %c0_i32 = arith.constant 0 : i32
    %c0_i32_0 = arith.constant 0 : i32
    %c0_i32_1 = arith.constant 0 : i32
    return %c0_i32, %c0_i32_0 : i32, i32
  }
  func.func @transform_2(%arg0: i32) -> (i32, i32) {
    %c0_i32 = arith.constant 0 : i32
    %c0_i32_0 = arith.constant 0 : i32
    %c0_i32_1 = arith.constant 0 : i32
    return %c0_i32, %c0_i32_0 : i32, i32
  }
  func.func @transform_3(%arg0: i32) -> (i32, i32) {
    %c0_i32 = arith.constant 0 : i32
    %c0_i32_0 = arith.constant 0 : i32
    %c0_i32_1 = arith.constant 0 : i32
    return %c0_i32, %c0_i32_0 : i32, i32
  }
  func.func @transform_4(%arg0: i32) -> (i32, i32) {
    %c0_i32 = arith.constant 0 : i32
    %c0_i32_0 = arith.constant 0 : i32
    %c0_i32_1 = arith.constant 0 : i32
    return %c0_i32, %c0_i32_0 : i32, i32
  }
  func.func @transform_5(%arg0: i32) -> (i32, i32) {
    %c0_i32 = arith.constant 0 : i32
    %c0_i32_0 = arith.constant 0 : i32
    return %arg0, %c0_i32 : i32, i32
  }
}

</mosaic_0001>

<bundles_post_ra>
// kernel: tpu_custom_call.1
= control target key start
LH: loop header
LB: loop body
LE: loop exit
PB: predicated region body
PF: predicated region fallthrough
CT: control target
= control target key end

     0   :  { %10 = vsyncpa [#allocation3], 0  ;;  %s1080_s0 = inlined_call_operand.vmem [shape: f32[8,784], index: 0, kind: input, shape index: {}]   ;;  %s1081_s1 = inlined_call_operand.hbm [shape: bf16[784,128], index: 1, kind: input, shape index: {}]   ;;  %s1082_s2 = inlined_call_operand.vmem [shape: f32[1,128], index: 2, kind: input, shape index: {}]   ;;  %s1083_s3 = inlined_call_operand.vmem [shape: bf16[128,10], index: 3, kind: input, shape index: {}]   ;;  %s1084_s4 = inlined_call_operand.vmem [shape: f32[1,10], index: 4, kind: input, shape index: {}]   ;;  %s1085_s5 = inlined_call_operand.hbm [shape: f32[8,10], index: 5, kind: output, shape index: {}]  }
   0x1   :  { %11 = vsyncpa [#allocation4], 0  ;;  %s18_s20 = sshll.u32 %s1081_s1, 4  ;;  %s989_s21 = smov [#allocation2]   ;;  %s19_s20 = int_to_ptr.hbm [resolvable:$true] %s18_s20 }
   0x2   :  { %s20_s22 = sshll.u32 %s989_s21, 4  ;;  %s990_s23 = smov 64   ;;  %s21_s22 = int_to_ptr.vmem [resolvable:$true] %s20_s22 }
   0x3   :  { %s991_s24 = smov 4  }
   0x4   :  { %26 = dma.hbm_to_vmem [thread:$0]  %s19_s20, 6272, %s21_s22, [#allocation3], %s990_s23, %s990_s23, %s991_s24  }
   0x5   :  { %985 = dma.done.wait [#allocation3], 6272  }
   0x6   :  { %986 = vsyncadd [#allocation3], 4294961024  ;;  %v881_v0 = vld [vmem:[#allocation2 + $0x38] sm:$0xff]  ;;  %v880_v3 = vld [vmem:[#allocation2 + $0x30] sm:$0xff]  ;;  %vm448_vm0 = vcmask 130048   ;;  %s992_s29 = smov [#allocation5]  }
   0x7   :  { %v889_v1 = vld [vmem:[#allocation2 + $0x78] sm:$0xff]  ;;  %452 = vmatpush.bf16.msra.mxu0 %v881_v0  ;;  %v888_v4 = vld [vmem:[#allocation2 + $0x70] sm:$0xff]  ;;  %v879_v8 = vld [vmem:[#allocation2 + $0x28] sm:$0xff]  ;;  %s633_s30 = sshll.u32 %s992_s29, 4  ;;  %s635_s8 = sshll.u32 %s1085_s5, 4  ;;  %vm626_vm1 = vcmask 80896   ;;  %s634_s30 = int_to_ptr.vmem [resolvable:$true] %s633_s30  ;;  %s636_s8 = int_to_ptr.hbm [resolvable:$true] %s635_s8 }
   0x8   :  { %v897_v2 = vld [vmem:[#allocation2 + $0xb8] sm:$0xff]  ;;  %465 = vmatpush.bf16.msra.mxu1 %v889_v1  ;;  %v896_v5 = vld [vmem:[#allocation2 + $0xb0] sm:$0xff]  ;;  %v887_v9 = vld [vmem:[#allocation2 + $0x68] sm:$0xff] }
   0x9   :  { %478 = vmatpush.bf16.msra.mxu2 %v897_v2  ;;  %v905_v6 = vld [vmem:[#allocation2 + $0xf8] sm:$0xff]  ;;  %v904_v7 = vld [vmem:[#allocation2 + $0xf0] sm:$0xff]  ;;  %v895_v10 = vld [vmem:[#allocation2 + $0xa8] sm:$0xff] }
   0xa   :  { %491 = vmatpush.bf16.msra.mxu3 %v905_v6  ;;  %v903_v11 = vld [vmem:[#allocation2 + $0xe8] sm:$0xff]  ;;  %v878_v12 = vld [vmem:[#allocation2 + $0x20] sm:$0xff]  ;;  %v877_v16 = vld [vmem:[#allocation2 + $0x18] sm:$0xff] }
   0xb   :  { %453 = vmatpush.bf16.msra.mxu0 %v880_v3  ;;  %v886_v13 = vld [vmem:[#allocation2 + $0x60] sm:$0xff]  ;;  %v885_v17 = vld [vmem:[#allocation2 + $0x58] sm:$0xff]  ;;  %v876_v20 = vld [vmem:[#allocation2 + $0x10] sm:$0xff] }
   0xc   :  { %466 = vmatpush.bf16.msra.mxu1 %v888_v4  ;;  %v894_v14 = vld [vmem:[#allocation2 + $0xa0] sm:$0xff]  ;;  %v893_v18 = vld [vmem:[#allocation2 + $0x98] sm:$0xff]  ;;  %v884_v21 = vld [vmem:[#allocation2 + $0x50] sm:$0xff] }
   0xd   :  { %479 = vmatpush.bf16.msra.mxu2 %v896_v5  ;;  %v902_v15 = vld [vmem:[#allocation2 + $0xe0] sm:$0xff]  ;;  %v901_v19 = vld [vmem:[#allocation2 + $0xd8] sm:$0xff]  ;;  %v892_v22 = vld [vmem:[#allocation2 + $0x90] sm:$0xff] }
   0xe   :  { %492 = vmatpush.bf16.msra.mxu3 %v904_v7  ;;  %v900_v23 = vld [vmem:[#allocation2 + $0xd0] sm:$0xff]  ;;  %v875_v24 = vld [vmem:[#allocation2 + $0x8] sm:$0xff]  ;;  %v874_v27 = vld [vmem:[#allocation2] sm:$0xff] }
   0xf   :  { %454 = vmatpush.bf16.msra.mxu0 %v879_v8  ;;  %v883_v25 = vld [vmem:[#allocation2 + $0x48] sm:$0xff]  ;;  %v882_v29 = vld [vmem:[#allocation2 + $0x40] sm:$0xff]  ;;  %v913_v32 = vld [vmem:[#allocation2 + $0x138] sm:$0xff] }
  0x10   :  { %467 = vmatpush.bf16.msra.mxu1 %v887_v9  ;;  %v891_v26 = vld [vmem:[#allocation2 + $0x88] sm:$0xff]  ;;  %v38_v30 = vld [vmem:[%s1080_s0] sm:$0xff]  ;;  %v921_v33 = vld [vmem:[#allocation2 + $0x178] sm:$0xff] }
  0x11   :  { %480 = vmatpush.bf16.msra.mxu2 %v895_v10  ;;  %v899_v28 = vld [vmem:[#allocation2 + $0xc8] sm:$0xff]  ;;  %v890_v34 = vld [vmem:[#allocation2 + $0x80] sm:$0xff]  ;;  %v40_v35 = vld [vmem:[%s1080_s0 + $0x10] sm:$0xff]  ;;  %v45_v36 = vpack.c.bf16 %v38_v30, %v38_v30 }
  0x12   :  { %493 = vmatpush.bf16.msra.mxu3 %v903_v11  ;;  %v39_v31 = vld [vmem:[%s1080_s0 + $0x8] sm:$0xff]  ;;  %v898_v38 = vld [vmem:[#allocation2 + $0xc0] sm:$0xff]  ;;  %v41_v40 = vld [vmem:[%s1080_s0 + $0x18] sm:$0xff]  ;;  %v47_v43 = vpack.c.bf16 %v40_v35, %v40_v35 }
  0x13   :  { %455 = vmatpush.bf16.msra.mxu0 %v878_v12  ;;  %v46_v37 = vpack.c.bf16 %v39_v31, %v39_v31  ;;  %v922_v39 = vld [vmem:[#allocation2 + $0x180] sm:$0xff]  ;;  %v912_v41 = vld [vmem:[#allocation2 + $0x130] sm:$0xff]  ;;  %v48_v44 = vpack.c.bf16 %v41_v40, %v41_v40  ;;  %v911_v45 = vld [vmem:[#allocation2 + $0x128] sm:$0xff] }
  0x14   :  { %468 = vmatpush.bf16.msra.mxu1 %v886_v13  ;;  %v920_v42 = vld [vmem:[#allocation2 + $0x170] sm:$0xff]  ;;  %v919_v46 = vld [vmem:[#allocation2 + $0x168] sm:$0xff]  ;;  %v910_v47 = vld [vmem:[#allocation2 + $0x120] sm:$0xff] }
  0x15   :  { %481 = vmatpush.bf16.msra.mxu2 %v894_v14  ;;  %v918_v48 = vld [vmem:[#allocation2 + $0x160] sm:$0xff]  ;;  %v909_v49 = vld [vmem:[#allocation2 + $0x118] sm:$0xff]  ;;  %v44_v51 = vld [vmem:[%s1080_s0 + $0x30] sm:$0xff] }
  0x16   :  { %494 = vmatpush.bf16.msra.mxu3 %v902_v15  ;;  %v917_v50 = vld [vmem:[#allocation2 + $0x158] sm:$0xff]  ;;  %v908_v52 = vld [vmem:[#allocation2 + $0x110] sm:$0xff]  ;;  %v51_v54 = vpack.c.bf16 %v44_v51, %v44_v51  ;;  %v907_v55 = vld [vmem:[#allocation2 + $0x108] sm:$0xff] }
  0x17   :  { %456 = vmatpush.bf16.msra.mxu0 %v877_v16  ;;  %v916_v53 = vld [vmem:[#allocation2 + $0x150] sm:$0xff]  ;;  %v915_v56 = vld [vmem:[#allocation2 + $0x148] sm:$0xff]  ;;  %v906_v57 = vld [vmem:[#allocation2 + $0x100] sm:$0xff] }
  0x18   :  { %469 = vmatpush.bf16.msra.mxu1 %v885_v17  ;;  %v914_v58 = vld [vmem:[#allocation2 + $0x140] sm:$0xff]  ;;  %v43_v60 = vld [vmem:[%s1080_s0 + $0x28] sm:$0xff]  ;;  %v930_v63 = vld [vmem:[%s1083_s3 + $0x38] sm:$0xff] }
  0x19   :  { %482 = vmatpush.bf16.msra.mxu2 %v893_v18  ;;  %v42_v59 = vld [vmem:[%s1080_s0 + $0x20] sm:$0xff]  ;;  %v50_v62 = vpack.c.bf16 %v43_v60, %v43_v60  ;;  %v929_v0 = vld [vmem:[%s1083_s3 + $0x30] sm:$0xff]  ;;  %v928_v1 = vld [vmem:[%s1083_s3 + $0x28] sm:$0xff] }
  0x1a   :  { %495 = vmatpush.bf16.msra.mxu3 %v901_v19  ;;  %v49_v61 = vpack.c.bf16 %v42_v59, %v42_v59  ;;  %v927_v2 = vld [vmem:[%s1083_s3 + $0x20] sm:$0xff]  ;;  %v926_v3 = vld [vmem:[%s1083_s3 + $0x18] sm:$0xff]  ;;  %v925_v4 = vld [vmem:[%s1083_s3 + $0x10] sm:$0xff] }
  0x1b   :  { %457 = vmatpush.bf16.msra.mxu0 %v876_v20  ;;  %v924_v5 = vld [vmem:[%s1083_s3 + $0x8] sm:$0xff]  ;;  %v923_v8 = vld [vmem:[%s1083_s3] sm:$0xff] }
  0x1c   :  { %470 = vmatpush.bf16.msra.mxu1 %v884_v21  ;;  %v935_v13 = vld [vmem:[%s1082_s2] ss:$0 sm:$0xff] }
  0x1d   :  { %483 = vmatpush.bf16.msra.mxu2 %v892_v22  ;;  %v936_v31 = vld [vmem:[%s1084_s4] ss:$0 sm:$0xff] }
  0x1e   :  { %496 = vmatpush.bf16.msra.mxu3 %v900_v23 }
  0x1f   :  { %458 = vmatpush.bf16.msra.mxu0 %v875_v24 }
  0x20   :  { %471 = vmatpush.bf16.msra.mxu1 %v883_v25 }
  0x21   :  { %484 = vmatpush.bf16.msra.mxu2 %v891_v26 }
  0x22   :  { %497 = vmatpush.bf16.msra.mxu3 %v899_v28 }
  0x23   :  { %459 = vmatpush.bf16.msra.mxu0 %v874_v27 }
  0x24   :  { %472 = vmatpush.bf16.msra.mxu1 %v882_v29 }
  0x25   :  { %485 = vmatpush.bf16.msra.mxu2 %v890_v34 }
  0x26   :  { %460 = vmatmul.bf16.vlgmr.msra.gmra.mxu0 %v45_v36  ;;  %498 = vmatpush.bf16.msra.mxu3 %v898_v38 }
  0x27   :  { %504 = vmatpush.bf16.msrb.mxu0 %v913_v32  ;;  %473 = vmatmul.bf16.vlgmr.msra.gmra.mxu1 %v46_v37 }
  0x28   :  { %517 = vmatpush.bf16.msrb.mxu1 %v921_v33  ;;  %486 = vmatmul.bf16.vlgmr.msra.gmra.mxu2 %v47_v43 }
  0x29   :  { %537 = vmatpush.bf16.msrb.mxu2 %v922_v39  ;;  %499 = vmatmul.bf16.vlgmr.msra.gmra.mxu3 %v48_v44 }
  0x2a   :  { %613 = vmatpush.bf16.msrb.mxu3 %v930_v63 }
  0x2b   :  { %505 = vmatpush.bf16.msrb.mxu0 %v912_v41 }
  0x2c   :  { %518 = vmatpush.bf16.msrb.mxu1 %v920_v42 }
  0x2e   :  { %614 = vmatpush.bf16.msrb.mxu3 %v929_v0 }
  0x2f   :  { %506 = vmatpush.bf16.msrb.mxu0 %v911_v45 }
  0x30   :  { %519 = vmatpush.bf16.msrb.mxu1 %v919_v46 }
  0x32   :  { %615 = vmatpush.bf16.msrb.mxu3 %v928_v1 }
  0x33   :  { %507 = vmatpush.bf16.msrb.mxu0 %v910_v47 }
  0x34   :  { %520 = vmatpush.bf16.msrb.mxu1 %v918_v48 }
  0x36   :  { %616 = vmatpush.bf16.msrb.mxu3 %v927_v2 }
  0x37   :  { %508 = vmatpush.bf16.msrb.mxu0 %v909_v49 }
  0x38   :  { %521 = vmatpush.bf16.msrb.mxu1 %v917_v50  ;;  %841 = vmatmul.msk.bf16.vlgmr.msrb.gmra.mxu2 %vm448_vm0, %v51_v54 }
  0x3a   :  { %617 = vmatpush.bf16.msrb.mxu3 %v926_v3 }
  0x3b   :  { %509 = vmatpush.bf16.msrb.mxu0 %v908_v52 }
  0x3c   :  { %522 = vmatpush.bf16.msrb.mxu1 %v916_v53 }
  0x3e   :  { %618 = vmatpush.bf16.msrb.mxu3 %v925_v4 }
  0x3f   :  { %510 = vmatpush.bf16.msrb.mxu0 %v907_v55 }
  0x40   :  { %523 = vmatpush.bf16.msrb.mxu1 %v915_v56 }
  0x42   :  { %619 = vmatpush.bf16.msrb.mxu3 %v924_v5 }
  0x43   :  { %511 = vmatpush.bf16.msrb.mxu0 %v906_v57 }
  0x44   :  { %524 = vmatpush.bf16.msrb.mxu1 %v914_v58 }
  0x46   :  { %512 = vmatmul.bf16.vlgmr.msrb.gmra.mxu0 %v49_v61  ;;  %620 = vmatpush.bf16.msrb.mxu3 %v923_v8 }
  0x47   :  { %525 = vmatmul.bf16.vlgmr.msrb.gmra.mxu1 %v50_v62 }
  0xa3   :  { %v461_v6 = vpop.f32.mrf.mxu0 }
  0xa4   :  { %v474_v7 = vpop.f32.mrf.mxu1  ;;  %v462_v14 = vadd.f32 %v935_v13, %v461_v6 }
  0xa6   :  { %v475_v17 = vadd.f32 %v474_v7, %v462_v14 }
  0xab   :  { %v463_v9 = vpop.f32.mrf.mxu0  ;;  %v487_v11 = vpop.f32.mrf.mxu2 }
  0xac   :  { %v476_v10 = vpop.f32.mrf.mxu1  ;;  %v500_v12 = vpop.f32.mrf.mxu3  ;;  %v488_v18 = vadd.f32 %v487_v11, %v475_v17 }
  0xae   :  { %v501_v20 = vadd.f32 %v500_v12, %v488_v18 }
  0xb3   :  { %v489_v15 = vpop.f32.mrf.mxu2 }
  0xb4   :  { %v502_v16 = vpop.f32.mrf.mxu3 }
  0xbb   :  { %v539_v19 = vpop.f32.mrf.mxu2 }
  0xc3   :  { %v513_v21 = vpop.f32.mrf.mxu0  ;;  %v541_v25 = vpop.f32.mrf.mxu2 }
  0xc4   :  { %v526_v22 = vpop.f32.mrf.mxu1  ;;  %v514_v23 = vadd.f32 %v513_v21, %v501_v20 }
  0xc6   :  { %v527_v24 = vadd.f32 %v526_v22, %v514_v23 }
  0xc8   :  { %v540_v26 = vadd.f32 %v539_v19, %v527_v24 }
  0xca   :  { %v543_v27 = vmax.f32 %v540_v26, 0.0 }
  0xcb   :  { %v515_v28 = vpop.f32.mrf.mxu0 }
  0xcc   :  { %v528_v29 = vpop.f32.mrf.mxu1  ;;  %v544_v30 = vpack.c.bf16 %v543_v27, %v543_v27 }
  0xce   :  { %621 = vmatmul.bf16.vlgmr.msrb.gmra.mxu3 %v544_v30 }
 0x151   :  { %v622_v32 = vpop.f32.mrf.mxu3 }
 0x152   :  { %v623_v33 = vadd.f32 %v936_v31, %v622_v32 }
 0x154   :  { %627 = vst.msk [vmem:[#allocation5] sm:$0xff] %vm626_vm1, %v623_v33 }
 0x155   :  { %638 = dma.vmem_to_hbm [thread:$0]  %s634_s30, 128, %s636_s8, [#allocation4]  }
 0x159   :  { %v624_v34 = vpop.f32.mrf.mxu3 }
 0x15a   :  { %987 = dma.done.wait [#allocation4], 128  }
 0x15b   :  { %988 = vsyncadd [#allocation4], 4294967168 }
 0x15c   :  { %643 = vsyncpa [#allocation3], 1 }
 0x15d   :  { %644 = vsyncpa [#allocation4], 1 }

</bundles_post_ra>
